<compile_context>
chip_gen: v6e
topology: v6e:2x2x1
jax: 0.10.0
libtpu: 0.0.40
codegen_flags: <defaults>
</compile_context>

<pallas_src>
import functools

import jax
import jax.numpy as jnp
from jax.experimental import pallas as pl
from jax.experimental.pallas import tpu as pltpu


def _im2col_row(x_row, *, k, pad, L_out, dtype):
    """One unpadded (Cin, L_in) row -> (k*Cin, L_out) im2col matrix in VMEM.

    Zero halo is built in VMEM (no HBM pad), taps are folded into the
    contraction dim so the conv is a single matmul per row.
    """
    xr = x_row.astype(dtype)
    if pad > 0:
        zp = jnp.zeros((xr.shape[0], pad), dtype)
        xr = jnp.concatenate([zp, xr, zp], axis=1)          # (Cin, L_in + 2*pad)
    return jnp.concatenate([xr[:, j:j + L_out] for j in range(k)], axis=0)


def _conv_stats_kernel(x_ref, w_ref, b_ref, stats_ref, *, k, pad, L_out, b_tile):
    """Pass 1: Conv1d + partial BN statistics, accumulated across the grid.

    x_ref:     (B_TILE, Cin, L)   unpadded input rows (NCL block).
    w_ref:     (Cout, k*Cin)      conv weight, taps folded (matmul dtype).
    b_ref:     (Cout, 1)          conv bias (f32).
    stats_ref: (Cout, 2)          resident accumulator: [:,0]=sum, [:,1]=sumsq.
    """
    @pl.when(pl.program_id(0) == 0)
    def _():
        stats_ref[...] = jnp.zeros_like(stats_ref)

    w = w_ref[...]
    bias = b_ref[...]
    # Pack all rows of this batch tile along the lane axis -> one MXU push
    # with a (k*Cin, B_TILE*L_out) RHS instead of B_TILE tiny contractions.
    xk = jnp.concatenate(
        [_im2col_row(x_ref[b], k=k, pad=pad, L_out=L_out, dtype=w.dtype)
         for b in range(b_tile)], axis=1)
    z = jnp.dot(w, xk, preferred_element_type=jnp.float32) + bias
    s1 = jnp.sum(z, axis=1, keepdims=True)                  # (Cout, 1)
    s2 = jnp.sum(z * z, axis=1, keepdims=True)              # (Cout, 1)
    stats_ref[...] += jnp.concatenate([s1, s2], axis=1)


def _fused_bn_relu_sam_kernel(x_ref, w_ref, b_ref, scale_ref, shift_ref,
                              w2_ref, b2_ref, o_ref, *, k, pad, L_out, b_tile):
    """Pass 2: conv recompute -> BN(scale/shift) -> ReLU -> ms_sam gate.

    scale_ref/shift_ref: (Cout, 1) folded BN scale/shift (VMEM, f32).
    w2_ref: (k, 2) SMEM   attention-conv taps, column 0 = avg, 1 = max.
    b2_ref: (1, 1) SMEM   attention-conv bias.
    o_ref:  (B_TILE, Cout, L_out) gated output rows (NCL layout).
    """
    w = w_ref[...]
    bias = b_ref[...]
    scale = scale_ref[...]
    shift = shift_ref[...]
    b2 = b2_ref[0, 0]

    for b in range(b_tile):                                 # static unroll
        xk = _im2col_row(x_ref[b], k=k, pad=pad, L_out=L_out, dtype=w.dtype)
        z = jnp.dot(w, xk, preferred_element_type=jnp.float32) + bias
        y = jnp.maximum(z * scale + shift, 0.0)             # (Cout, L_out) f32

        # Channel pooling (sublane reductions on the XLU).
        avg = jnp.mean(y, axis=0, keepdims=True)            # (1, L_out)
        mx = jnp.max(y, axis=0, keepdims=True)
        if pad > 0:                                         # Conv1d zero halo
            zp = jnp.zeros((1, pad), jnp.float32)
            avg = jnp.concatenate([zp, avg, zp], axis=1)
            mx = jnp.concatenate([zp, mx, zp], axis=1)

        # 2 -> 1 attention conv (k scalar taps from SMEM), sigmoid, gate.
        acc = jnp.zeros((1, L_out), jnp.float32) + b2
        for j in range(k):
            acc = acc + avg[:, j:j + L_out] * w2_ref[j, 0]
            acc = acc + mx[:, j:j + L_out] * w2_ref[j, 1]
        sam = jax.nn.sigmoid(acc)                           # (1, L_out)
        o_ref[b] = (y * sam).astype(o_ref.dtype)            # broadcast rows


def _pick_b_tile(B, bytes_per_row, *, max_rows=8, block_budget_bytes=4 << 20):
    """Largest divisor of B that fits the per-step VMEM block budget."""
    cap = int(max(1, min(max_rows, block_budget_bytes // max(bytes_per_row, 1))))
    bt = 1
    for d in range(1, min(cap, B) + 1):
        if B % d == 0:
            bt = d
    return bt


def conv_forward(x, params, *, kernel_size, pad, eps=1e-5,
                 matmul_dtype=jnp.bfloat16, out_dtype=jnp.float32,
                 vmem_limit_bytes=48 * 1024 * 1024,
                 block_budget_bytes=4 * 1024 * 1024):
    """Forward of `conv(i_dim, o_dim, kernel_size, pad, sam=True)`.

    x: (B, Cin, L) float32, PyTorch NCL layout.  Returns (B, Cout, L_out), NCL.
    BatchNorm1d runs in training mode (batch statistics, biased variance).
    As in the PyTorch module, the ms_sam gate requires 2*pad == kernel_size-1.

    matmul_dtype: MXU operand dtype (bf16 default; native on v5e/v6e/v7x).
      x is cast in VMEM, so no extra HBM traffic; elementwise math stays f32.
    vmem_limit_bytes / block_budget_bytes: per-generation knobs.  Defaults are
      safe on v7x (64 MiB VMEM/TC); v5e/v6e can raise both (128 MiB VMEM).
    """
    w, b, gamma, beta, w2, b2 = params
    B, Cin, L = x.shape
    Cout = w.shape[0]
    k = kernel_size
    Lout = L + 2 * pad - k + 1
    if 2 * pad != k - 1:
        raise ValueError("ms_sam gating requires 2*pad == kernel_size - 1")

    # Layout plumbing on tiny parameter tensors only; x is passed untouched.
    w_r = (jnp.transpose(w, (0, 2, 1)).reshape(Cout, k * Cin)
           .astype(matmul_dtype))                            # (Cout, k*Cin)
    b_col = b.reshape(Cout, 1).astype(jnp.float32)
    w2_t = jnp.transpose(w2[0], (1, 0)).astype(jnp.float32)  # (k, 2)
    b2_s = b2.reshape(1, 1).astype(jnp.float32)              # (1, 1)

    # Batch-tile sizing: double-buffered x/out blocks + in-kernel intermediates.
    x_esz = jnp.dtype(x.dtype).itemsize
    o_esz = jnp.dtype(out_dtype).itemsize
    bytes_per_row = (2 * (Cin * L * x_esz + Cout * Lout * o_esz)
                     + 4 * (k * Cin + 4 * Cout) * (Lout + 2 * pad))
    B_TILE = _pick_b_tile(B, bytes_per_row, block_budget_bytes=block_budget_bytes)
    num_tiles = B // B_TILE

    x_spec = pl.BlockSpec((B_TILE, Cin, L), lambda i: (i, 0, 0))
    w_spec = pl.BlockSpec((Cout, k * Cin), lambda i: (0, 0))
    col_spec = pl.BlockSpec((Cout, 1), lambda i: (0, 0))
    smem = pltpu.MemorySpace.SMEM

    conv_flops = 2 * B * Lout * k * Cin * Cout
    mm_esz = jnp.dtype(matmul_dtype).itemsize

    # ---- Pass 1: conv + BN statistics accumulated in-kernel. ----
    # The batch axis is a reduction onto the resident (Cout, 2) block, so it
    # must be "arbitrary".  TODO(synk): on v7x, add a size-2 "parallel"
    # leading axis emitting (2, Cout, 2) partials to use both TensorCores.
    stats = pl.pallas_call(
        functools.partial(_conv_stats_kernel, k=k, pad=pad, L_out=Lout,
                          b_tile=B_TILE),
        out_shape=jax.ShapeDtypeStruct((Cout, 2), jnp.float32),
        grid=(num_tiles,),
        in_specs=[x_spec, w_spec, col_spec],
        out_specs=pl.BlockSpec((Cout, 2), lambda i: (0, 0)),
        compiler_params=pltpu.CompilerParams(
            dimension_semantics=("arbitrary",),
            vmem_limit_bytes=vmem_limit_bytes),
        cost_estimate=pl.CostEstimate(
            flops=conv_flops + 3 * B * Lout * Cout,
            transcendentals=0,
            bytes_accessed=x_esz * B * Cin * L + mm_esz * Cout * k * Cin
                           + 4 * 3 * Cout),
    )(x, w_r, b_col)

    # Tiny O(Cout) finalize: fold batch stats + gamma/beta into scale/shift.
    n = B * Lout
    mean = stats[:, 0] / n
    var = jnp.maximum(stats[:, 1] / n - mean * mean, 0.0)    # biased variance
    scale = gamma.astype(jnp.float32) * jax.lax.rsqrt(var + eps)
    shift = beta.astype(jnp.float32) - mean * scale

    # ---- Pass 2: conv recompute + BN + ReLU + ms_sam, fused. ----
    out = pl.pallas_call(
        functools.partial(_fused_bn_relu_sam_kernel, k=k, pad=pad, L_out=Lout,
                          b_tile=B_TILE),
        out_shape=jax.ShapeDtypeStruct((B, Cout, Lout), out_dtype),
        grid=(num_tiles,),
        in_specs=[x_spec, w_spec, col_spec, col_spec, col_spec,
                  pl.BlockSpec((k, 2), lambda i: (0, 0), memory_space=smem),
                  pl.BlockSpec((1, 1), lambda i: (0, 0), memory_space=smem)],
        out_specs=pl.BlockSpec((B_TILE, Cout, Lout), lambda i: (i, 0, 0)),
        compiler_params=pltpu.CompilerParams(
            dimension_semantics=("parallel",),
            vmem_limit_bytes=vmem_limit_bytes),
        cost_estimate=pl.CostEstimate(
            flops=conv_flops + 12 * B * Lout * Cout,
            transcendentals=B * Lout,
            bytes_accessed=x_esz * B * Cin * L + mm_esz * Cout * k * Cin
                           + o_esz * B * Cout * Lout + 4 * 3 * Cout),
    )(x, w_r, b_col, scale.reshape(Cout, 1), shift.reshape(Cout, 1),
      w2_t, b2_s)

    return out


def conv_forward_ref(x, params, *, kernel_size, pad, eps=1e-5):
    """Pure-JAX reference replicating the PyTorch forward (training-mode BN)."""
    w, b, gamma, beta, w2, b2 = params
    dn = ('NCH', 'OIH', 'NCH')
    z = jax.lax.conv_general_dilated(x, w, (1,), [(pad, pad)],
                                     dimension_numbers=dn) + b[None, :, None]
    mean = jnp.mean(z, axis=(0, 2), keepdims=True)
    var = jnp.mean((z - mean) ** 2, axis=(0, 2), keepdims=True)
    y = (z - mean) * jax.lax.rsqrt(var + eps)
    y = y * gamma[None, :, None] + beta[None, :, None]
    y = jnp.maximum(y, 0.0)
    avg = jnp.mean(y, axis=1, keepdims=True)
    mx = jnp.max(y, axis=1, keepdims=True)
    sm = jnp.concatenate([avg, mx], axis=1)
    sm = jax.lax.conv_general_dilated(sm, w2, (1,), [(pad, pad)],
                                      dimension_numbers=dn) + b2[None, :, None]
    return y * jax.nn.sigmoid(sm)


if __name__ == "__main__":
    # Small shapes consistent with the module: conv(i_dim=4, o_dim=8, k=3, pad=1)
    B, Cin, Cout, L, K, PAD = 2, 4, 8, 16, 3, 1

    key = jax.random.PRNGKey(0)
    k1, k2, k3, k4, k5, k6, k7 = jax.random.split(key, 7)

    bound1 = 1.0 / (Cin * K) ** 0.5
    w = jax.random.uniform(k1, (Cout, Cin, K), jnp.float32, -bound1, bound1)
    b = jax.random.uniform(k2, (Cout,), jnp.float32, -bound1, bound1)
    gamma = 1.0 + 0.1 * jax.random.normal(k3, (Cout,), jnp.float32)
    beta = 0.1 * jax.random.normal(k4, (Cout,), jnp.float32)
    bound2 = 1.0 / (2 * K) ** 0.5
    w2 = jax.random.uniform(k5, (1, 2, K), jnp.float32, -bound2, bound2)
    b2 = jax.random.uniform(k6, (1,), jnp.float32, -bound2, bound2)
    params = (w, b, gamma, beta, w2, b2)

    x = jax.random.normal(k7, (B, Cin, L), jnp.float32)
    ref = conv_forward_ref(x, params, kernel_size=K, pad=PAD)

    # f32 MXU operands: tight correctness check against the f32 reference.
    out_f32 = jax.jit(functools.partial(conv_forward, kernel_size=K, pad=PAD,
                                        matmul_dtype=jnp.float32))(x, params)
    out_f32 = jax.block_until_ready(out_f32)
    assert out_f32.shape == (B, Cout, L), out_f32.shape
    assert jnp.allclose(out_f32, ref, atol=2e-4, rtol=2e-4), float(
        jnp.max(jnp.abs(out_f32 - ref)))

    # Default (bf16 MXU operands): looser tolerance for expected bf16 rounding.
    out_bf16 = jax.jit(
        functools.partial(conv_forward, kernel_size=K, pad=PAD)
    )(x, params)
    out_bf16 = jax.block_until_ready(out_bf16)
    assert out_bf16.shape == (B, Cout, L), out_bf16.shape
    assert jnp.allclose(out_bf16, ref, atol=5e-2, rtol=5e-2), float(
        jnp.max(jnp.abs(out_bf16 - ref)))

    print("KERNEL_OK")
</pallas_src>

<mosaic_0001>
module attributes {stable_mosaic.version = 11 : i64} {
  func.func @_conv_stats_kernel(%arg0: i32, %arg1: memref<2x4x16xf32, #tpu.memory_space<vmem>>, %arg2: memref<8x12xf32, #tpu.memory_space<vmem>>, %arg3: memref<8x1xf32, #tpu.memory_space<vmem>>, %arg4: memref<8x2xf32, #tpu.memory_space<vmem>>) attributes {dimension_semantics = [#tpu.dimension_semantics<arbitrary>], iteration_bounds = array<i64: 1>, scalar_prefetch = 0 : i64, scratch_operands = 0 : i64, tpu.core_type = #tpu.core_type<tc>, window_params = [{transform_indices = @transform_0, window_bounds = array<i64: 2, 4, 16>}, {pipeline_mode = #tpu.pipeline_mode<synchronous>, transform_indices = @transform_1, window_bounds = array<i64: 8, 12>}, {pipeline_mode = #tpu.pipeline_mode<synchronous>, transform_indices = @transform_2, window_bounds = array<i64: 8, 1>}, {pipeline_mode = #tpu.pipeline_mode<synchronous>, transform_indices = @transform_3, window_bounds = array<i64: 8, 2>}]} {
    %c0_i32 = arith.constant 0 : i32
    %0 = arith.cmpi eq, %arg0, %c0_i32 : i32
    %1 = arith.extui %0 : i1 to i32
    %c0_i32_0 = arith.constant 0 : i32
    %2 = arith.cmpi ne, %1, %c0_i32_0 : i32
    scf.if %2 {
      %cst_17 = arith.constant 0.000000e+00 : f32
      %34 = vector.broadcast %cst_17 : f32 to vector<8x2xf32>
      %c0_18 = arith.constant 0 : index
      %c0_19 = arith.constant 0 : index
      %35 = vector.load %arg4[%c0_18, %c0_19] : memref<8x2xf32, #tpu.memory_space<vmem>>, vector<8x2xf32>
      tpu.vector_store %arg4[%c0_18, %c0_19], %34 {strides = array<i32>} : memref<8x2xf32, #tpu.memory_space<vmem>>, vector<8x2xf32>,
    } else {
    }
    %c0 = arith.constant 0 : index
    %c0_1 = arith.constant 0 : index
    %3 = vector.load %arg2[%c0, %c0_1] : memref<8x12xf32, #tpu.memory_space<vmem>>, vector<8x12xf32>
    %c0_2 = arith.constant 0 : index
    %c0_3 = arith.constant 0 : index
    %4 = vector.load %arg3[%c0_2, %c0_3] : memref<8x1xf32, #tpu.memory_space<vmem>>, vector<8x1xf32>
    %c0_4 = arith.constant 0 : index
    %c0_5 = arith.constant 0 : index
    %c0_6 = arith.constant 0 : index
    %5 = vector.load %arg1[%c0_4, %c0_5, %c0_6] : memref<2x4x16xf32, #tpu.memory_space<vmem>>, vector<1x4x16xf32>
    %6 = vector.shape_cast %5 : vector<1x4x16xf32> to vector<4x16xf32>
    %cst = arith.constant 0.000000e+00 : f32
    %7 = vector.broadcast %cst : f32 to vector<4x1xf32>
    %8 = tpu.concatenate %7, %6, %7 in 1 : vector<4x1xf32>, vector<4x16xf32>, vector<4x1xf32> -> vector<4x18xf32>
    %9 = vector.extract_strided_slice %8 {offsets = [0, 0], sizes = [4, 16], strides = [1, 1]} : vector<4x18xf32> to vector<4x16xf32>
    %10 = vector.extract_strided_slice %8 {offsets = [0, 1], sizes = [4, 16], strides = [1, 1]} : vector<4x18xf32> to vector<4x16xf32>
    %11 = vector.extract_strided_slice %8 {offsets = [0, 2], sizes = [4, 16], strides = [1, 1]} : vector<4x18xf32> to vector<4x16xf32>
    %12 = tpu.concatenate %9, %10, %11 in 0 : vector<4x16xf32>, vector<4x16xf32>, vector<4x16xf32> -> vector<12x16xf32>
    %c1 = arith.constant 1 : index
    %c0_7 = arith.constant 0 : index
    %c0_8 = arith.constant 0 : index
    %13 = vector.load %arg1[%c1, %c0_7, %c0_8] : memref<2x4x16xf32, #tpu.memory_space<vmem>>, vector<1x4x16xf32>
    %14 = vector.shape_cast %13 : vector<1x4x16xf32> to vector<4x16xf32>
    %cst_9 = arith.constant 0.000000e+00 : f32
    %15 = vector.broadcast %cst_9 : f32 to vector<4x1xf32>
    %16 = tpu.concatenate %15, %14, %15 in 1 : vector<4x1xf32>, vector<4x16xf32>, vector<4x1xf32> -> vector<4x18xf32>
    %17 = vector.extract_strided_slice %16 {offsets = [0, 0], sizes = [4, 16], strides = [1, 1]} : vector<4x18xf32> to vector<4x16xf32>
    %18 = vector.extract_strided_slice %16 {offsets = [0, 1], sizes = [4, 16], strides = [1, 1]} : vector<4x18xf32> to vector<4x16xf32>
    %19 = vector.extract_strided_slice %16 {offsets = [0, 2], sizes = [4, 16], strides = [1, 1]} : vector<4x18xf32> to vector<4x16xf32>
    %20 = tpu.concatenate %17, %18, %19 in 0 : vector<4x16xf32>, vector<4x16xf32>, vector<4x16xf32> -> vector<12x16xf32>
    %21 = tpu.concatenate %12, %20 in 1 : vector<12x16xf32>, vector<12x16xf32> -> vector<12x32xf32>
    %cst_10 = arith.constant dense<0.000000e+00> : vector<8x32xf32>
    %22 = tpu.matmul %3, %21, %cst_10 {dimension_numbers = #tpu.dot_dimension_numbers<[1], [0], [0], [1], [0, 0, 1, 1], [], []>} : vector<8x12xf32>, vector<12x32xf32>, vector<8x32xf32> -> vector<8x32xf32>
    %23 = vector.broadcast %4 : vector<8x1xf32> to vector<8x32xf32>
    %24 = arith.addf %22, %23 : vector<8x32xf32>
    %cst_11 = arith.constant dense<0.000000e+00> : vector<8xf32>
    %25 = vector.multi_reduction <add>, %24, %cst_11 [1] : vector<8x32xf32> to vector<8xf32>
    %26 = vector.shape_cast %25 : vector<8xf32> to vector<8x1xf32>
    %27 = arith.mulf %24, %24 : vector<8x32xf32>
    %cst_12 = arith.constant dense<0.000000e+00> : vector<8xf32>
    %28 = vector.multi_reduction <add>, %27, %cst_12 [1] : vector<8x32xf32> to vector<8xf32>
    %29 = vector.shape_cast %28 : vector<8xf32> to vector<8x1xf32>
    %c0_13 = arith.constant 0 : index
    %c0_14 = arith.constant 0 : index
    %30 = vector.load %arg4[%c0_13, %c0_14] : memref<8x2xf32, #tpu.memory_space<vmem>>, vector<8x2xf32>
    %31 = tpu.concatenate %26, %29 in 1 : vector<8x1xf32>, vector<8x1xf32> -> vector<8x2xf32>
    %32 = arith.addf %30, %31 : vector<8x2xf32>
    %c0_15 = arith.constant 0 : index
    %c0_16 = arith.constant 0 : index
    %33 = vector.load %arg4[%c0_15, %c0_16] : memref<8x2xf32, #tpu.memory_space<vmem>>, vector<8x2xf32>
    tpu.vector_store %arg4[%c0_15, %c0_16], %32 {strides = array<i32>} : memref<8x2xf32, #tpu.memory_space<vmem>>, vector<8x2xf32>,
    return
  }
  func.func @transform_0(%arg0: i32) -> (i32, i32, i32) {
    %c0_i32 = arith.constant 0 : i32
    %c0_i32_0 = arith.constant 0 : i32
    %c0_i32_1 = arith.constant 0 : i32
    return %arg0, %c0_i32, %c0_i32_0 : i32, i32, i32
  }
  func.func @transform_1(%arg0: i32) -> (i32, i32) {
    %c0_i32 = arith.constant 0 : i32
    %c0_i32_0 = arith.constant 0 : i32
    %c0_i32_1 = arith.constant 0 : i32
    return %c0_i32, %c0_i32_0 : i32, i32
  }
  func.func @transform_2(%arg0: i32) -> (i32, i32) {
    %c0_i32 = arith.constant 0 : i32
    %c0_i32_0 = arith.constant 0 : i32
    %c0_i32_1 = arith.constant 0 : i32
    return %c0_i32, %c0_i32_0 : i32, i32
  }
  func.func @transform_3(%arg0: i32) -> (i32, i32) {
    %c0_i32 = arith.constant 0 : i32
    %c0_i32_0 = arith.constant 0 : i32
    %c0_i32_1 = arith.constant 0 : i32
    return %c0_i32, %c0_i32_0 : i32, i32
  }
}

module attributes {stable_mosaic.version = 11 : i64} {
  func.func @_fused_bn_relu_sam_kernel(%arg0: i32, %arg1: memref<2x4x16xf32, #tpu.memory_space<vmem>>, %arg2: memref<8x12xf32, #tpu.memory_space<vmem>>, %arg3: memref<8x1xf32, #tpu.memory_space<vmem>>, %arg4: memref<8x1xf32, #tpu.memory_space<vmem>>, %arg5: memref<8x1xf32, #tpu.memory_space<vmem>>, %arg6: memref<3x2xf32, #tpu.memory_space<smem>>, %arg7: memref<1x1xf32, #tpu.memory_space<smem>>, %arg8: memref<2x8x16xf32, #tpu.memory_space<vmem>>) attributes {dimension_semantics = [#tpu.dimension_semantics<parallel>], iteration_bounds = array<i64: 1>, scalar_prefetch = 0 : i64, scratch_operands = 0 : i64, tpu.core_type = #tpu.core_type<tc>, window_params = [{transform_indices = @transform_0, window_bounds = array<i64: 2, 4, 16>}, {pipeline_mode = #tpu.pipeline_mode<synchronous>, transform_indices = @transform_1, window_bounds = array<i64: 8, 12>}, {pipeline_mode = #tpu.pipeline_mode<synchronous>, transform_indices = @transform_2, window_bounds = array<i64: 8, 1>}, {pipeline_mode = #tpu.pipeline_mode<synchronous>, transform_indices = @transform_3, window_bounds = array<i64: 8, 1>}, {pipeline_mode = #tpu.pipeline_mode<synchronous>, transform_indices = @transform_4, window_bounds = array<i64: 8, 1>}, {transform_indices = @transform_5, window_bounds = array<i64: 3, 2>}, {transform_indices = @transform_6, window_bounds = array<i64: 1, 1>}, {transform_indices = @transform_7, window_bounds = array<i64: 2, 8, 16>}]} {
    %c0 = arith.constant 0 : index
    %c0_0 = arith.constant 0 : index
    %0 = vector.load %arg2[%c0, %c0_0] : memref<8x12xf32, #tpu.memory_space<vmem>>, vector<8x12xf32>
    %c0_1 = arith.constant 0 : index
    %c0_2 = arith.constant 0 : index
    %1 = vector.load %arg3[%c0_1, %c0_2] : memref<8x1xf32, #tpu.memory_space<vmem>>, vector<8x1xf32>
    %c0_3 = arith.constant 0 : index
    %c0_4 = arith.constant 0 : index
    %2 = vector.load %arg4[%c0_3, %c0_4] : memref<8x1xf32, #tpu.memory_space<vmem>>, vector<8x1xf32>
    %c0_5 = arith.constant 0 : index
    %c0_6 = arith.constant 0 : index
    %3 = vector.load %arg5[%c0_5, %c0_6] : memref<8x1xf32, #tpu.memory_space<vmem>>, vector<8x1xf32>
    %c0_7 = arith.constant 0 : index
    %c0_8 = arith.constant 0 : index
    %4 = memref.load %arg7[%c0_7, %c0_8] : memref<1x1xf32, #tpu.memory_space<smem>>
    %c0_9 = arith.constant 0 : index
    %c0_10 = arith.constant 0 : index
    %c0_11 = arith.constant 0 : index
    %5 = vector.load %arg1[%c0_9, %c0_10, %c0_11] : memref<2x4x16xf32, #tpu.memory_space<vmem>>, vector<1x4x16xf32>
    %6 = vector.shape_cast %5 : vector<1x4x16xf32> to vector<4x16xf32>
    %cst = arith.constant 0.000000e+00 : f32
    %7 = vector.broadcast %cst : f32 to vector<4x1xf32>
    %8 = tpu.concatenate %7, %6, %7 in 1 : vector<4x1xf32>, vector<4x16xf32>, vector<4x1xf32> -> vector<4x18xf32>
    %9 = vector.extract_strided_slice %8 {offsets = [0, 0], sizes = [4, 16], strides = [1, 1]} : vector<4x18xf32> to vector<4x16xf32>
    %10 = vector.extract_strided_slice %8 {offsets = [0, 1], sizes = [4, 16], strides = [1, 1]} : vector<4x18xf32> to vector<4x16xf32>
    %11 = vector.extract_strided_slice %8 {offsets = [0, 2], sizes = [4, 16], strides = [1, 1]} : vector<4x18xf32> to vector<4x16xf32>
    %12 = tpu.concatenate %9, %10, %11 in 0 : vector<4x16xf32>, vector<4x16xf32>, vector<4x16xf32> -> vector<12x16xf32>
    %cst_12 = arith.constant dense<0.000000e+00> : vector<8x16xf32>
    %13 = tpu.matmul %0, %12, %cst_12 {dimension_numbers = #tpu.dot_dimension_numbers<[1], [0], [0], [1], [0, 0, 1, 1], [], []>} : vector<8x12xf32>, vector<12x16xf32>, vector<8x16xf32> -> vector<8x16xf32>
    %14 = vector.broadcast %1 : vector<8x1xf32> to vector<8x16xf32>
    %15 = arith.addf %13, %14 : vector<8x16xf32>
    %16 = vector.broadcast %2 : vector<8x1xf32> to vector<8x16xf32>
    %17 = arith.mulf %15, %16 : vector<8x16xf32>
    %18 = vector.broadcast %3 : vector<8x1xf32> to vector<8x16xf32>
    %19 = arith.addf %17, %18 : vector<8x16xf32>
    %cst_13 = arith.constant 0.000000e+00 : f32
    %20 = vector.broadcast %cst_13 : f32 to vector<8x16xf32>
    %21 = arith.maximumf %19, %20 : vector<8x16xf32>
    %cst_14 = arith.constant dense<0.000000e+00> : vector<16xf32>
    %22 = vector.multi_reduction <add>, %21, %cst_14 [0] : vector<8x16xf32> to vector<16xf32>
    %23 = vector.shape_cast %22 : vector<16xf32> to vector<1x16xf32>
    %cst_15 = arith.constant 8.000000e+00 : f32
    %24 = vector.broadcast %cst_15 : f32 to vector<1x16xf32>
    %25 = arith.divf %23, %24 : vector<1x16xf32>
    %cst_16 = arith.constant dense<0xFF800000> : vector<16xf32>
    %26 = vector.multi_reduction <maximumf>, %21, %cst_16 [0] : vector<8x16xf32> to vector<16xf32>
    %27 = vector.shape_cast %26 : vector<16xf32> to vector<1x16xf32>
    %cst_17 = arith.constant 0.000000e+00 : f32
    %28 = vector.broadcast %cst_17 : f32 to vector<1x1xf32>
    %29 = tpu.concatenate %28, %25, %28 in 1 : vector<1x1xf32>, vector<1x16xf32>, vector<1x1xf32> -> vector<1x18xf32>
    %30 = tpu.concatenate %28, %27, %28 in 1 : vector<1x1xf32>, vector<1x16xf32>, vector<1x1xf32> -> vector<1x18xf32>
    %cst_18 = arith.constant 0.000000e+00 : f32
    %31 = vector.broadcast %cst_18 : f32 to vector<1x16xf32>
    %32 = vector.broadcast %4 : f32 to vector<1x16xf32>
    %33 = arith.addf %31, %32 : vector<1x16xf32>
    %34 = vector.extract_strided_slice %29 {offsets = [0, 0], sizes = [1, 16], strides = [1, 1]} : vector<1x18xf32> to vector<1x16xf32>
    %c0_19 = arith.constant 0 : index
    %c0_20 = arith.constant 0 : index
    %35 = memref.load %arg6[%c0_19, %c0_20] : memref<3x2xf32, #tpu.memory_space<smem>>
    %36 = vector.broadcast %35 : f32 to vector<1x16xf32>
    %37 = arith.mulf %34, %36 : vector<1x16xf32>
    %38 = arith.addf %33, %37 : vector<1x16xf32>
    %39 = vector.extract_strided_slice %30 {offsets = [0, 0], sizes = [1, 16], strides = [1, 1]} : vector<1x18xf32> to vector<1x16xf32>
    %c0_21 = arith.constant 0 : index
    %c1 = arith.constant 1 : index
    %40 = memref.load %arg6[%c0_21, %c1] : memref<3x2xf32, #tpu.memory_space<smem>>
    %41 = vector.broadcast %40 : f32 to vector<1x16xf32>
    %42 = arith.mulf %39, %41 : vector<1x16xf32>
    %43 = arith.addf %38, %42 : vector<1x16xf32>
    %44 = vector.extract_strided_slice %29 {offsets = [0, 1], sizes = [1, 16], strides = [1, 1]} : vector<1x18xf32> to vector<1x16xf32>
    %c1_22 = arith.constant 1 : index
    %c0_23 = arith.constant 0 : index
    %45 = memref.load %arg6[%c1_22, %c0_23] : memref<3x2xf32, #tpu.memory_space<smem>>
    %46 = vector.broadcast %45 : f32 to vector<1x16xf32>
    %47 = arith.mulf %44, %46 : vector<1x16xf32>
    %48 = arith.addf %43, %47 : vector<1x16xf32>
    %49 = vector.extract_strided_slice %30 {offsets = [0, 1], sizes = [1, 16], strides = [1, 1]} : vector<1x18xf32> to vector<1x16xf32>
    %c1_24 = arith.constant 1 : index
    %c1_25 = arith.constant 1 : index
    %50 = memref.load %arg6[%c1_24, %c1_25] : memref<3x2xf32, #tpu.memory_space<smem>>
    %51 = vector.broadcast %50 : f32 to vector<1x16xf32>
    %52 = arith.mulf %49, %51 : vector<1x16xf32>
    %53 = arith.addf %48, %52 : vector<1x16xf32>
    %54 = vector.extract_strided_slice %29 {offsets = [0, 2], sizes = [1, 16], strides = [1, 1]} : vector<1x18xf32> to vector<1x16xf32>
    %c2 = arith.constant 2 : index
    %c0_26 = arith.constant 0 : index
    %55 = memref.load %arg6[%c2, %c0_26] : memref<3x2xf32, #tpu.memory_space<smem>>
    %56 = vector.broadcast %55 : f32 to vector<1x16xf32>
    %57 = arith.mulf %54, %56 : vector<1x16xf32>
    %58 = arith.addf %53, %57 : vector<1x16xf32>
    %59 = vector.extract_strided_slice %30 {offsets = [0, 2], sizes = [1, 16], strides = [1, 1]} : vector<1x18xf32> to vector<1x16xf32>
    %c2_27 = arith.constant 2 : index
    %c1_28 = arith.constant 1 : index
    %60 = memref.load %arg6[%c2_27, %c1_28] : memref<3x2xf32, #tpu.memory_space<smem>>
    %61 = vector.broadcast %60 : f32 to vector<1x16xf32>
    %62 = arith.mulf %59, %61 : vector<1x16xf32>
    %63 = arith.addf %58, %62 : vector<1x16xf32>
    %64 = arith.negf %63 : vector<1x16xf32>
    %65 = math.exp %64 : vector<1x16xf32>
    %cst_29 = arith.constant 1.000000e+00 : f32
    %66 = vector.broadcast %cst_29 : f32 to vector<1x16xf32>
    %67 = arith.addf %66, %65 : vector<1x16xf32>
    %68 = arith.divf %66, %67 : vector<1x16xf32>
    %69 = vector.broadcast %68 : vector<1x16xf32> to vector<8x16xf32>
    %70 = arith.mulf %21, %69 : vector<8x16xf32>
    %c0_30 = arith.constant 0 : index
    %c0_31 = arith.constant 0 : index
    %c0_32 = arith.constant 0 : index
    %71 = vector.load %arg8[%c0_30, %c0_31, %c0_32] : memref<2x8x16xf32, #tpu.memory_space<vmem>>, vector<1x8x16xf32>
    %72 = vector.shape_cast %71 : vector<1x8x16xf32> to vector<8x16xf32>
    %73 = vector.shape_cast %70 : vector<8x16xf32> to vector<1x8x16xf32>
    tpu.vector_store %arg8[%c0_30, %c0_31, %c0_32], %73 {strides = array<i32>} : memref<2x8x16xf32, #tpu.memory_space<vmem>>, vector<1x8x16xf32>,
    %c1_33 = arith.constant 1 : index
    %c0_34 = arith.constant 0 : index
    %c0_35 = arith.constant 0 : index
    %74 = vector.load %arg1[%c1_33, %c0_34, %c0_35] : memref<2x4x16xf32, #tpu.memory_space<vmem>>, vector<1x4x16xf32>
    %75 = vector.shape_cast %74 : vector<1x4x16xf32> to vector<4x16xf32>
    %cst_36 = arith.constant 0.000000e+00 : f32
    %76 = vector.broadcast %cst_36 : f32 to vector<4x1xf32>
    %77 = tpu.concatenate %76, %75, %76 in 1 : vector<4x1xf32>, vector<4x16xf32>, vector<4x1xf32> -> vector<4x18xf32>
    %78 = vector.extract_strided_slice %77 {offsets = [0, 0], sizes = [4, 16], strides = [1, 1]} : vector<4x18xf32> to vector<4x16xf32>
    %79 = vector.extract_strided_slice %77 {offsets = [0, 1], sizes = [4, 16], strides = [1, 1]} : vector<4x18xf32> to vector<4x16xf32>
    %80 = vector.extract_strided_slice %77 {offsets = [0, 2], sizes = [4, 16], strides = [1, 1]} : vector<4x18xf32> to vector<4x16xf32>
    %81 = tpu.concatenate %78, %79, %80 in 0 : vector<4x16xf32>, vector<4x16xf32>, vector<4x16xf32> -> vector<12x16xf32>
    %cst_37 = arith.constant dense<0.000000e+00> : vector<8x16xf32>
    %82 = tpu.matmul %0, %81, %cst_37 {dimension_numbers = #tpu.dot_dimension_numbers<[1], [0], [0], [1], [0, 0, 1, 1], [], []>} : vector<8x12xf32>, vector<12x16xf32>, vector<8x16xf32> -> vector<8x16xf32>
    %83 = vector.broadcast %1 : vector<8x1xf32> to vector<8x16xf32>
    %84 = arith.addf %82, %83 : vector<8x16xf32>
    %85 = vector.broadcast %2 : vector<8x1xf32> to vector<8x16xf32>
    %86 = arith.mulf %84, %85 : vector<8x16xf32>
    %87 = vector.broadcast %3 : vector<8x1xf32> to vector<8x16xf32>
    %88 = arith.addf %86, %87 : vector<8x16xf32>
    %cst_38 = arith.constant 0.000000e+00 : f32
    %89 = vector.broadcast %cst_38 : f32 to vector<8x16xf32>
    %90 = arith.maximumf %88, %89 : vector<8x16xf32>
    %cst_39 = arith.constant dense<0.000000e+00> : vector<16xf32>
    %91 = vector.multi_reduction <add>, %90, %cst_39 [0] : vector<8x16xf32> to vector<16xf32>
    %92 = vector.shape_cast %91 : vector<16xf32> to vector<1x16xf32>
    %cst_40 = arith.constant 8.000000e+00 : f32
    %93 = vector.broadcast %cst_40 : f32 to vector<1x16xf32>
    %94 = arith.divf %92, %93 : vector<1x16xf32>
    %cst_41 = arith.constant dense<0xFF800000> : vector<16xf32>
    %95 = vector.multi_reduction <maximumf>, %90, %cst_41 [0] : vector<8x16xf32> to vector<16xf32>
    %96 = vector.shape_cast %95 : vector<16xf32> to vector<1x16xf32>
    %cst_42 = arith.constant 0.000000e+00 : f32
    %97 = vector.broadcast %cst_42 : f32 to vector<1x1xf32>
    %98 = tpu.concatenate %97, %94, %97 in 1 : vector<1x1xf32>, vector<1x16xf32>, vector<1x1xf32> -> vector<1x18xf32>
    %99 = tpu.concatenate %97, %96, %97 in 1 : vector<1x1xf32>, vector<1x16xf32>, vector<1x1xf32> -> vector<1x18xf32>
    %cst_43 = arith.constant 0.000000e+00 : f32
    %100 = vector.broadcast %cst_43 : f32 to vector<1x16xf32>
    %101 = vector.broadcast %4 : f32 to vector<1x16xf32>
    %102 = arith.addf %100, %101 : vector<1x16xf32>
    %103 = vector.extract_strided_slice %98 {offsets = [0, 0], sizes = [1, 16], strides = [1, 1]} : vector<1x18xf32> to vector<1x16xf32>
    %c0_44 = arith.constant 0 : index
    %c0_45 = arith.constant 0 : index
    %104 = memref.load %arg6[%c0_44, %c0_45] : memref<3x2xf32, #tpu.memory_space<smem>>
    %105 = vector.broadcast %104 : f32 to vector<1x16xf32>
    %106 = arith.mulf %103, %105 : vector<1x16xf32>
    %107 = arith.addf %102, %106 : vector<1x16xf32>
    %108 = vector.extract_strided_slice %99 {offsets = [0, 0], sizes = [1, 16], strides = [1, 1]} : vector<1x18xf32> to vector<1x16xf32>
    %c0_46 = arith.constant 0 : index
    %c1_47 = arith.constant 1 : index
    %109 = memref.load %arg6[%c0_46, %c1_47] : memref<3x2xf32, #tpu.memory_space<smem>>
    %110 = vector.broadcast %109 : f32 to vector<1x16xf32>
    %111 = arith.mulf %108, %110 : vector<1x16xf32>
    %112 = arith.addf %107, %111 : vector<1x16xf32>
    %113 = vector.extract_strided_slice %98 {offsets = [0, 1], sizes = [1, 16], strides = [1, 1]} : vector<1x18xf32> to vector<1x16xf32>
    %c1_48 = arith.constant 1 : index
    %c0_49 = arith.constant 0 : index
    %114 = memref.load %arg6[%c1_48, %c0_49] : memref<3x2xf32, #tpu.memory_space<smem>>
    %115 = vector.broadcast %114 : f32 to vector<1x16xf32>
    %116 = arith.mulf %113, %115 : vector<1x16xf32>
    %117 = arith.addf %112, %116 : vector<1x16xf32>
    %118 = vector.extract_strided_slice %99 {offsets = [0, 1], sizes = [1, 16], strides = [1, 1]} : vector<1x18xf32> to vector<1x16xf32>
    %c1_50 = arith.constant 1 : index
    %c1_51 = arith.constant 1 : index
    %119 = memref.load %arg6[%c1_50, %c1_51] : memref<3x2xf32, #tpu.memory_space<smem>>
    %120 = vector.broadcast %119 : f32 to vector<1x16xf32>
    %121 = arith.mulf %118, %120 : vector<1x16xf32>
    %122 = arith.addf %117, %121 : vector<1x16xf32>
    %123 = vector.extract_strided_slice %98 {offsets = [0, 2], sizes = [1, 16], strides = [1, 1]} : vector<1x18xf32> to vector<1x16xf32>
    %c2_52 = arith.constant 2 : index
    %c0_53 = arith.constant 0 : index
    %124 = memref.load %arg6[%c2_52, %c0_53] : memref<3x2xf32, #tpu.memory_space<smem>>
    %125 = vector.broadcast %124 : f32 to vector<1x16xf32>
    %126 = arith.mulf %123, %125 : vector<1x16xf32>
    %127 = arith.addf %122, %126 : vector<1x16xf32>
    %128 = vector.extract_strided_slice %99 {offsets = [0, 2], sizes = [1, 16], strides = [1, 1]} : vector<1x18xf32> to vector<1x16xf32>
    %c2_54 = arith.constant 2 : index
    %c1_55 = arith.constant 1 : index
    %129 = memref.load %arg6[%c2_54, %c1_55] : memref<3x2xf32, #tpu.memory_space<smem>>
    %130 = vector.broadcast %129 : f32 to vector<1x16xf32>
    %131 = arith.mulf %128, %130 : vector<1x16xf32>
    %132 = arith.addf %127, %131 : vector<1x16xf32>
    %133 = arith.negf %132 : vector<1x16xf32>
    %134 = math.exp %133 : vector<1x16xf32>
    %cst_56 = arith.constant 1.000000e+00 : f32
    %135 = vector.broadcast %cst_56 : f32 to vector<1x16xf32>
    %136 = arith.addf %135, %134 : vector<1x16xf32>
    %137 = arith.divf %135, %136 : vector<1x16xf32>
    %138 = vector.broadcast %137 : vector<1x16xf32> to vector<8x16xf32>
    %139 = arith.mulf %90, %138 : vector<8x16xf32>
    %c1_57 = arith.constant 1 : index
    %c0_58 = arith.constant 0 : index
    %c0_59 = arith.constant 0 : index
    %140 = vector.load %arg8[%c1_57, %c0_58, %c0_59] : memref<2x8x16xf32, #tpu.memory_space<vmem>>, vector<1x8x16xf32>
    %141 = vector.shape_cast %140 : vector<1x8x16xf32> to vector<8x16xf32>
    %142 = vector.shape_cast %139 : vector<8x16xf32> to vector<1x8x16xf32>
    tpu.vector_store %arg8[%c1_57, %c0_58, %c0_59], %142 {strides = array<i32>} : memref<2x8x16xf32, #tpu.memory_space<vmem>>, vector<1x8x16xf32>,
    return
  }
  func.func @transform_0(%arg0: i32) -> (i32, i32, i32) {
    %c0_i32 = arith.constant 0 : i32
    %c0_i32_0 = arith.constant 0 : i32
    %c0_i32_1 = arith.constant 0 : i32
    return %arg0, %c0_i32, %c0_i32_0 : i32, i32, i32
  }
  func.func @transform_1(%arg0: i32) -> (i32, i32) {
    %c0_i32 = arith.constant 0 : i32
    %c0_i32_0 = arith.constant 0 : i32
    %c0_i32_1 = arith.constant 0 : i32
    return %c0_i32, %c0_i32_0 : i32, i32
  }
  func.func @transform_2(%arg0: i32) -> (i32, i32) {
    %c0_i32 = arith.constant 0 : i32
    %c0_i32_0 = arith.constant 0 : i32
    %c0_i32_1 = arith.constant 0 : i32
    return %c0_i32, %c0_i32_0 : i32, i32
  }
  func.func @transform_3(%arg0: i32) -> (i32, i32) {
    %c0_i32 = arith.constant 0 : i32
    %c0_i32_0 = arith.constant 0 : i32
    %c0_i32_1 = arith.constant 0 : i32
    return %c0_i32, %c0_i32_0 : i32, i32
  }
  func.func @transform_4(%arg0: i32) -> (i32, i32) {
    %c0_i32 = arith.constant 0 : i32
    %c0_i32_0 = arith.constant 0 : i32
    %c0_i32_1 = arith.constant 0 : i32
    return %c0_i32, %c0_i32_0 : i32, i32
  }
  func.func @transform_5(%arg0: i32) -> (i32, i32) {
    %c0_i32 = arith.constant 0 : i32
    %c0_i32_0 = arith.constant 0 : i32
    %c0_i32_1 = arith.constant 0 : i32
    return %c0_i32, %c0_i32_0 : i32, i32
  }
  func.func @transform_6(%arg0: i32) -> (i32, i32) {
    %c0_i32 = arith.constant 0 : i32
    %c0_i32_0 = arith.constant 0 : i32
    %c0_i32_1 = arith.constant 0 : i32
    return %c0_i32, %c0_i32_0 : i32, i32
  }
  func.func @transform_7(%arg0: i32) -> (i32, i32, i32) {
    %c0_i32 = arith.constant 0 : i32
    %c0_i32_0 = arith.constant 0 : i32
    %c0_i32_1 = arith.constant 0 : i32
    return %arg0, %c0_i32, %c0_i32_0 : i32, i32, i32
  }
}

</mosaic_0001>

<bundles_post_ra>
// kernel: conv_forward.2
= control target key start
LH: loop header
LB: loop body
LE: loop exit
PB: predicated region body
PF: predicated region fallthrough
CT: control target
= control target key end

     0   :  { %s187_s14 = smov 1   ;;  %vm27_vm0 = vcmask 7168   ;;  %vm29_vm1 = vcmask 138240   ;;  %s188_s17 = smov 126   ;;  %v190_v10 = vmov 0.0   ;;  %vm191_vm2 = vmmov 0   ;;  %s238_s0 = inlined_call_operand.vmem [shape: f32[2,4,16], index: 0, kind: input, shape index: {}]   ;;  %s239_s2 = inlined_call_operand.vmem [shape: f32[8,1], index: 2, kind: input, shape index: {}]   ;;  %s240_s1 = inlined_call_operand.vmem [shape: f32[8,12], index: 1, kind: input, shape index: {}]   ;;  %s241_s3 = inlined_call_operand.vmem [shape: f32[8,2], index: 3, kind: output, shape index: {}]  }
   0x1   :  { %v166_v0 = vld [vmem:[%s238_s0 + $0x4] sm:$0xf]  ;;  %v22_v1 = vld [vmem:[%s238_s0] sm:$0xf]  ;;  %s189_s18 = smov 127   ;;  %172 = vmatprep.subr.mxu0 %v190_v10  ;;  %176 = vmatprep.mubr.msk.f32.mxu0 %vm191_vm2, %v190_v10  ;;  %v192_v11 = vmov 0  }
   0x2   :  { %44 = vrot.lane.b32.xlu0 %v166_v0, %s187_s14  ;;  %v21_v12 = vld [vmem:[%s239_s2] sm:$0xff]  ;;  %s193_s20 = smov 16   ;;  %vm39_vm3 = vcmask 1043456   ;;  %vm64_vm4 = vcmask 130048   ;;  %vm72_vm5 = vcmask 97280   ;;  %vm149_vm6 = vcmask 261120  }
   0x3   :  { %186 = vset.pattern.permute.xlu0 %v192_v11  ;;  %v20_v22 = vld [vmem:[%s240_s1] sm:$0xff]  ;;  %vm18_vm7 = vcmask 15360  }
   0x4   :  { %19 = vst.msk [vmem:[%s241_s3] sm:$0xff] %vm18_vm7, %v190_v10 }
   0x6   :  { %24 = vrot.lane.b32.xlu0 %v22_v1, %s187_s14 }
   0xb   :  { %v157_v31 = vld [vmem:[%s241_s3] sm:$0xff] }
  0x74   :  { %v45_v2 = vpop.permute.xlu0 %44 }
  0x75   :  { %v47_v3 = vsel %vm27_vm0, 0.0, %v45_v2 }
  0x76   :  { %v48_v4 = vsel %vm29_vm1, %v47_v3, 0.0 }
  0x77   :  { %54 = vrot.lane.b32.xlu1 %v48_v4, %s188_s17  ;;  %v50_v6 = vrot.slane %v48_v4, 4 }
  0x78   :  { %v25_v5 = vpop.permute.xlu0 %24 }
  0x79   :  { %v28_v7 = vsel %vm27_vm0, 0.0, %v25_v5 }
  0x7a   :  { %v30_v8 = vsel %vm29_vm1, %v28_v7, 0.0 }
  0x7b   :  { %v32_v9 = vrot.slane %v30_v8, 4  ;;  %51 = vrot.lane.b32.xlu1 %v50_v6, %s189_s18  ;;  %36 = vrot.lane.b32.xlu0 %v30_v8, %s188_s17 }
  0x7f   :  { %33 = vrot.lane.b32.xlu0 %v32_v9, %s189_s18 }
  0x83   :  { %69 = vperm.xlu0 %186, %v21_v12  }
  0xe9   :  { %v55_v13 = vpop.permute.xlu1 %54 }
  0xea   :  { %60 = vrot.lane.b32.xlu1 %v55_v13, %s193_s20 }
  0xed   :  { %v52_v14 = vpop.permute.xlu1 %51  ;;  %v37_v16 = vpop.permute.xlu0 %36 }
  0xee   :  { %v56_v15 = vsel %vm39_vm3, %v48_v4, %v52_v14 }
  0xef   :  { %58 = vrot.lane.b32.xlu1 %v56_v15, %s193_s20 }
  0xf1   :  { %v34_v19 = vpop.permute.xlu0 %33 }
  0xf2   :  { %v40_v20 = vsel %vm39_vm3, %v30_v8, %v34_v19 }
  0xfe   :  { %v70_v24 = vpop.permute.xlu0 %69 }
 0x15c   :  { %v61_v17 = vpop.permute.xlu1 %60 }
 0x15d   :  { %v66_v18 = vsel %vm64_vm4, %v37_v16, %v61_v17 }
 0x15e   :  { %173 = vmatpush3.msk.msra.mxu0 %vm39_vm3, %v66_v18 }
 0x15f   :  { %174 = vmatprep.subr.mxu0 %v190_v10 }
 0x161   :  { %v59_v21 = vpop.permute.xlu1 %58 }
 0x162   :  { %v65_v23 = vsel %vm64_vm4, %v40_v20, %v59_v21 }
 0x163   :  { %175 = vmatpush3.msra.mxu0 %v65_v23 }
 0x164   :  { %177 = vmatmul.mubr.msk.f32.vlgmr.msra.gmra.mxu0 %vm72_vm5, %v20_v22 }
 0x224   :  { %v145_v25 = vpop.f32.mrf.mxu0 }
 0x225   :  { %v146_v26 = vadd.f32 %v145_v25, %v70_v24 }
 0x226   :  { %v178_v27 = vpop.f32.mrf.mxu0 }
 0x227   :  { %v150_v28 = vsel %vm149_vm6, %v146_v26, 0.0  ;;  %v153_v29 = vmul.f32 %v146_v26, %v146_v26 }
 0x228   :  { %151 = vadd.xlane.f32.xlu1 %v150_v28 }
 0x229   :  { %v154_v30 = vsel %vm149_vm6, %v153_v29, 0.0 }
 0x22a   :  { %155 = vadd.xlane.f32.xlu0 %v154_v30 }
 0x2b1   :  { %v152_v32 = vpop.xlane.xlu1 %151 }
 0x2b3   :  { %v156_v33 = vpop.xlane.xlu0 %155 }
 0x2b4   :  { %v158_v34 = vsel %vm27_vm0, %v152_v32, %v156_v33 }
 0x2b5   :  { %v159_v35 = vadd.f32 %v158_v34, %v157_v31 }
 0x2b7   :  { %161 = vst.msk [vmem:[%s241_s3] sm:$0xff] %vm18_vm7, %v159_v35 }

// kernel: conv_forward.3
= control target key start
LH: loop header
LB: loop body
LE: loop exit
PB: predicated region body
PF: predicated region fallthrough
CT: control target
= control target key end

     0   :  { %13 = vsyncpa [#allocation5], 0  ;;  %s657_s0 = inlined_call_operand.vmem [shape: f32[2,4,16], index: 0, kind: input, shape index: {}]   ;;  %s658_s1 = inlined_call_operand.vmem [shape: f32[8,12], index: 1, kind: input, shape index: {}]   ;;  %s659_s2 = inlined_call_operand.vmem [shape: f32[8,1], index: 2, kind: input, shape index: {}]   ;;  %s660_s3 = inlined_call_operand.vmem [shape: f32[8,1], index: 3, kind: input, shape index: {}]   ;;  %s661_s4 = inlined_call_operand.vmem [shape: f32[8,1], index: 4, kind: input, shape index: {}]   ;;  %s662_s5 = inlined_call_operand.vmem [shape: f32[3,2], index: 5, kind: input, shape index: {}]   ;;  %s663_s6 = inlined_call_operand.<no memory space> [shape: f32[1,1], index: 6, kind: input, shape index: {}]   ;;  %s664_s7 = inlined_call_operand.hbm [shape: f32[2,8,16], index: 7, kind: output, shape index: {}]  }
   0x1   :  { %14 = vsyncpa [#allocation4], 0  ;;  %s31_s26 = sshll.u32 %s662_s5, 4  ;;  %s32_s26 = int_to_ptr.vmem [resolvable:$true] %s31_s26 }
   0x2   :  { %s486_s27 = scalar_lea.vmem %s32_s26, 64  ;;  %p491_p1 = scmp.lt.s32.totalorder %s32_s26, %s32_s26 }
   0x3   :  { %p487_p0 = scmp.ne.s32.totalorder %s32_s26, %s486_s27  ;;  %p492_p2 = scmp.lt.s32.totalorder %s486_s27, %s486_s27 }
   0x5   :  { %p493_p3 = por %p492_p2, %p491_p1 }
   0x7   :  { %p494_p4 = pnand %p493_p3, %p487_p0 }
   0x9   :  { %497 = shalt.err (!%p494_p4)
}
   0xa   :  { %s522_s28 = smov [#allocation3]  }
   0xb   :  { %34 = dma.vmem_to_smem %s32_s26, 64, %s522_s28, [#allocation5]  }
   0xc   :  { %518 = dma.done.wait [#allocation5], 64  }
   0xd   :  { %519 = vsyncadd [#allocation5], 4294967232 }
   0xe   :  { %40 = sfence }
   0xf   :  { %v46_v0 = vld [vmem:[%s657_s0] sm:$0xf]  ;;  %s523_s8 = smov 1   ;;  %v437_v1 = vld [vmem:[%s657_s0 + $0x4] sm:$0xf]  ;;  %v524_v2 = vmov 0.0  }
  0x10   :  { %48 = vrot.lane.b32.xlu0 %v46_v0, %s523_s8  ;;  %452 = vmatprep.subr.mxu0 %v524_v2  ;;  %vm525_vm0 = vmmov 0   ;;  %vm51_vm1 = vcmask 7168   ;;  %vm53_vm2 = vcmask 138240   ;;  %v526_v5 = vmov 0   ;;  %s527_s0 = smov 126   ;;  %s528_s10 = smov 127  }
  0x11   :  { %459 = vmatprep.subr.mxu1 %v524_v2  ;;  %456 = vmatprep.mubr.msk.f32.mxu0 %vm525_vm0, %v524_v2  ;;  %v42_v11 = vld [vmem:[%s659_s2] sm:$0xff]  ;;  %vm62_vm3 = vcmask 1043456   ;;  %vm69_vm4 = vcmask 97280   ;;  %vm158_vm5 = vcmask 130048   ;;  %s623_s18 = sld [smem:[#allocation3 + $0x80]] }
  0x12   :  { %463 = vmatprep.mubr.msk.f32.mxu1 %vm525_vm0, %v524_v2  ;;  %477 = vset.pattern.permute.xlu1 %v526_v5  ;;  %v43_v13 = vld [vmem:[%s660_s3] sm:$0xff]  ;;  %s619_s3 = sld [smem:[#allocation3 + $0x1]] }
  0x13   :  { %476 = vset.pattern.permute.xlu0 %v526_v5  ;;  %v44_v14 = vld [vmem:[%s661_s4] sm:$0xff]  ;;  %s621_s4 = sld [smem:[#allocation3 + $0x81]] }
  0x14   :  { %244 = vrot.lane.b32.xlu0 %v437_v1, %s523_s8  ;;  %v41_v17 = vld [vmem:[%s658_s1] sm:$0xff]  ;;  %s189_s1 = sld [smem:[#allocation3]] }
  0x15   :  { %s627_s19 = sld [smem:[#allocation3 + $0x100]] }
  0x16   :  { %s435_s22 = sld [smem:[#allocation3 + $0x101]] }
  0x82   :  { %v49_v3 = vpop.permute.xlu0 %48 }
  0x83   :  { %v52_v4 = vsel %vm51_vm1, 0.0, %v49_v3  ;;  %v190_v3 = vstv %s189_s1 }
  0x84   :  { %v54_v6 = vsel %vm53_vm2, %v52_v4, 0.0 }
  0x85   :  { %v56_v7 = vrot.slane %v54_v6, 4  ;;  %60 = vrot.lane.b32.xlu1 %v54_v6, %s527_s0 }
  0x86   :  { %v245_v8 = vpop.permute.xlu0 %244 }
  0x87   :  { %v247_v9 = vsel %vm51_vm1, 0.0, %v245_v8  ;;  %57 = vrot.lane.b32.xlu0 %v56_v7, %s528_s10  ;;  %v194_v8 = vstv %s619_s3 }
  0x88   :  { %v248_v10 = vsel %vm53_vm2, %v247_v9, 0.0  ;;  %v206_v9 = vstv %s621_s4 }
  0x89   :  { %254 = vrot.lane.b32.xlu1 %v248_v10, %s527_s0  ;;  %v250_v12 = vrot.slane %v248_v10, 4 }
  0x8b   :  { %66 = vperm.xlu0 %476, %v42_v11   ;;  %v187_v11 = vstv %s663_s6  ;;  %s529_s6 = smov [#allocation6]  }
  0x8c   :  { %s417_s23 = sshll.u32 %s529_s6, 4  ;;  %s418_s23 = int_to_ptr.vmem [resolvable:$true] %s417_s23 }
  0x8d   :  { %251 = vrot.lane.b32.xlu1 %v250_v12, %s528_s10  ;;  %s498_s24 = scalar_lea.vmem %s418_s23, 256  ;;  %p503_p6 = scmp.lt.s32.totalorder %s418_s23, %s418_s23 }
  0x8e   :  { %p499_p5 = scmp.ne.s32.totalorder %s418_s23, %s498_s24  ;;  %p504_p7 = scmp.lt.s32.totalorder %s498_s24, %s498_s24 }
  0x90   :  { %p505_p8 = por %p504_p7, %p503_p6 }
  0x91   :  { %147 = vperm.xlu1 %477, %v43_v13  }
  0x92   :  { %p506_p9 = pnand %p505_p8, %p499_p5 }
  0x95   :  { %153 = vperm.xlu1 %477, %v44_v14  }
  0xf7   :  { %v61_v15 = vpop.permute.xlu1 %60 }
  0xf8   :  { %453 = vmatpush3.msk.msra.mxu0 %vm62_vm3, %v61_v15 }
  0xf9   :  { %v58_v16 = vpop.permute.xlu0 %57  ;;  %454 = vmatprep.subr.mxu0 %v524_v2 }
  0xfa   :  { %v63_v18 = vsel %vm62_vm3, %v54_v6, %v58_v16 }
  0xfb   :  { %v255_v19 = vpop.permute.xlu1 %254  ;;  %455 = vmatpush3.msra.mxu0 %v63_v18 }
  0xfc   :  { %457 = vmatmul.mubr.msk.f32.vlgmr.msra.gmra.mxu0 %vm69_vm4, %v41_v17  ;;  %460 = vmatpush3.msk.msra.mxu1 %vm62_vm3, %v255_v19  ;;  %v198_v19 = vstv %s623_s18 }
  0xfd   :  { %461 = vmatprep.subr.mxu1 %v524_v2 }
  0xff   :  { %v252_v20 = vpop.permute.xlu1 %251 }
 0x100   :  { %v256_v21 = vsel %vm62_vm3, %v248_v10, %v252_v20 }
 0x101   :  { %462 = vmatpush3.msra.mxu1 %v256_v21 }
 0x102   :  { %464 = vmatmul.mubr.msk.f32.vlgmr.msra.gmra.mxu1 %vm69_vm4, %v41_v17 }
 0x106   :  { %v67_v23 = vpop.permute.xlu0 %66 }
 0x10c   :  { %v148_v22 = vpop.permute.xlu1 %147 }
 0x110   :  { %v154_v26 = vpop.permute.xlu1 %153 }
 0x1bc   :  { %v141_v24 = vpop.f32.mrf.mxu0 }
 0x1bd   :  { %v142_v25 = vadd.f32 %v141_v24, %v67_v23 }
 0x1be   :  { %v458_v27 = vpop.f32.mrf.mxu0 }
 0x1bf   :  { %v150_v28 = vmul.f32 %v148_v22, %v142_v25 }
 0x1c1   :  { %v156_v29 = vadd.f32 %v154_v26, %v150_v28 }
 0x1c2   :  { %v325_v30 = vpop.f32.mrf.mxu1 }
 0x1c3   :  { %v603_v31 = vmax.f32 %v156_v29, 0.0  ;;  %v326_v32 = vadd.f32 %v325_v30, %v67_v23 }
 0x1c4   :  { %v465_v33 = vpop.f32.mrf.mxu1 }
 0x1c5   :  { %v159_v34 = vsel %vm158_vm5, %v603_v31, 0.0  ;;  %v168_v35 = vsel %vm158_vm5, %v603_v31, -inf  ;;  %v329_v36 = vmul.f32 %v326_v32, %v148_v22 }
 0x1c6   :  { %v160_v37 = vrot.slane %v159_v34, 4  ;;  %v169_v38 = vrot.slane %v168_v35, 4 }
 0x1c7   :  { %v330_v39 = vadd.f32 %v329_v36, %v154_v26  ;;  %v214_v26 = vstv %s627_s19 }
 0x1c8   :  { %v161_v40 = vadd.f32 %v160_v37, %v159_v34  ;;  %v170_v41 = vmax.f32 %v168_v35, %v169_v38  ;;  %v222_v34 = vstv %s435_s22 }
 0x1c9   :  { %v609_v42 = vmax.f32 %v330_v39, 0.0 }
 0x1ca   :  { %v162_v43 = vrot.slane %v161_v40, 2  ;;  %v171_v44 = vrot.slane %v170_v41, 2 }
 0x1cb   :  { %v332_v45 = vsel %vm158_vm5, %v609_v42, 0.0  ;;  %v340_v46 = vsel %vm158_vm5, %v609_v42, -inf }
 0x1cc   :  { %v163_v47 = vadd.f32 %v162_v43, %v161_v40  ;;  %v333_v48 = vrot.slane %v332_v45, 4  ;;  %v341_v49 = vrot.slane %v340_v46, 4  ;;  %v172_v51 = vmax.f32 %v170_v41, %v171_v44 }
 0x1ce   :  { %v164_v50 = vrot.slane %v163_v47, 1  ;;  %v334_v52 = vadd.f32 %v333_v48, %v332_v45  ;;  %v342_v53 = vmax.f32 %v340_v46, %v341_v49  ;;  %v173_v58 = vrot.slane %v172_v51, 1 }
 0x1d0   :  { %v165_v54 = vadd.f32 %v164_v50, %v163_v47  ;;  %v335_v55 = vrot.slane %v334_v52, 2  ;;  %v343_v56 = vrot.slane %v342_v53, 2  ;;  %v174_v62 = vmax.f32 %v172_v51, %v173_v58 }
 0x1d2   :  { %v167_v57 = vmul.f32 0.125, %v165_v54  ;;  %v336_v59 = vadd.f32 %v335_v55, %v334_v52  ;;  %v344_v61 = vmax.f32 %v342_v53, %v343_v56 }
 0x1d4   :  { %176 = vrot.lane.b32.xlu0 %v167_v57, %s523_s8  ;;  %v337_v60 = vrot.slane %v336_v59, 1  ;;  %v345_v1 = vrot.slane %v344_v61, 1 }
 0x1d6   :  { %v338_v63 = vadd.f32 %v337_v60, %v336_v59  ;;  %v346_v2 = vmax.f32 %v344_v61, %v345_v1  ;;  %v235_v60 = vlaneseq }
 0x1d8   :  { %182 = vrot.lane.b32.xlu0 %v174_v62, %s523_s8  ;;  %v339_v0 = vmul.f32 0.125, %v338_v63  ;;  %v236_v63 = vshrl.u32 %v235_v60, 7 }
 0x1da   :  { %348 = vrot.lane.b32.xlu1 %v339_v0, %s523_s8  ;;  %v237_v0 = vsub.s32 0, %v236_v63 }
 0x1de   :  { %354 = vrot.lane.b32.xlu1 %v346_v2, %s523_s8 }
 0x246   :  { %v177_v4 = vpop.permute.xlu0 %176 }
 0x247   :  { %v179_v5 = vsel %vm51_vm1, 0.0, %v177_v4 }
 0x248   :  { %v180_v6 = vsel %vm53_vm2, %v179_v5, 0.0 }
 0x249   :  { %v191_v7 = vmul.f32 %v190_v3, %v180_v6  ;;  %v199_v24 = vmul.f32 %v198_v19, %v180_v6  ;;  %v215_v32 = vmul.f32 %v214_v26, %v180_v6 }
 0x24a   :  { %v183_v10 = vpop.permute.xlu0 %182 }
 0x24b   :  { %v185_v12 = vsel %vm51_vm1, 0.0, %v183_v10  ;;  %v192_v18 = vadd.f32 %v191_v7, %v187_v11 }
 0x24c   :  { %v186_v13 = vsel %vm53_vm2, %v185_v12, 0.0  ;;  %v349_v14 = vpop.permute.xlu1 %348 }
 0x24d   :  { %v195_v15 = vmul.f32 %v194_v8, %v186_v13  ;;  %v207_v16 = vmul.f32 %v206_v9, %v186_v13  ;;  %v351_v17 = vsel %vm51_vm1, 0.0, %v349_v14  ;;  %v223_v36 = vmul.f32 %v222_v34, %v186_v13 }
 0x24e   :  { %v352_v20 = vsel %vm53_vm2, %v351_v17, 0.0 }
 0x24f   :  { %v361_v21 = vmul.f32 %v352_v20, %v190_v3  ;;  %209 = vrot.lane.b32.xlu0 %v207_v16, %s528_s10  ;;  %v196_v22 = vadd.f32 %v195_v15, %v192_v18  ;;  %v369_v35 = vmul.f32 %v352_v20, %v198_v19  ;;  %v385_v37 = vmul.f32 %v352_v20, %v214_v26 }
 0x250   :  { %v355_v23 = vpop.permute.xlu1 %354 }
 0x251   :  { %v357_v25 = vsel %vm51_vm1, 0.0, %v355_v23  ;;  %v362_v30 = vadd.f32 %v361_v21, %v187_v11 }
 0x252   :  { %v358_v27 = vsel %vm53_vm2, %v357_v25, 0.0 }
 0x253   :  { %v365_v28 = vmul.f32 %v358_v27, %v194_v8  ;;  %v377_v29 = vmul.f32 %v358_v27, %v206_v9  ;;  %201 = vrot.lane.b32.xlu0 %v199_v24, %s528_s10  ;;  %v393_v38 = vmul.f32 %v358_v27, %v222_v34 }
 0x255   :  { %379 = vrot.lane.b32.xlu1 %v377_v29, %s528_s10  ;;  %v366_v33 = vadd.f32 %v365_v28, %v362_v30 }
 0x257   :  { %217 = vrot.lane.b32.xlu0 %v215_v32, %s527_s0 }
 0x259   :  { %371 = vrot.lane.b32.xlu1 %v369_v35, %s528_s10 }
 0x25b   :  { %225 = vrot.lane.b32.xlu0 %v223_v36, %s527_s0 }
 0x25d   :  { %387 = vrot.lane.b32.xlu1 %v385_v37, %s527_s0 }
 0x261   :  { %395 = vrot.lane.b32.xlu1 %v393_v38, %s527_s0 }
 0x2c1   :  { %v210_v39 = vpop.permute.xlu0 %209 }
 0x2c5   :  { %v202_v40 = vpop.permute.xlu0 %201 }
 0x2c6   :  { %v204_v41 = vadd.f32 %v202_v40, %v196_v22 }
 0x2c7   :  { %v380_v43 = vpop.permute.xlu1 %379 }
 0x2c8   :  { %v212_v44 = vadd.f32 %v210_v39, %v204_v41 }
 0x2c9   :  { %v218_v45 = vpop.permute.xlu0 %217 }
 0x2ca   :  { %v220_v47 = vadd.f32 %v218_v45, %v212_v44 }
 0x2cb   :  { %v372_v46 = vpop.permute.xlu1 %371 }
 0x2cc   :  { %v374_v48 = vadd.f32 %v372_v46, %v366_v33 }
 0x2cd   :  { %v226_v49 = vpop.permute.xlu0 %225 }
 0x2ce   :  { %v228_v50 = vadd.f32 %v226_v49, %v220_v47  ;;  %v382_v51 = vadd.f32 %v380_v43, %v374_v48 }
 0x2cf   :  { %v388_v52 = vpop.permute.xlu1 %387 }
 0x2d0   :  { %v436_v53 = vmul.f32 -1.442695, %v228_v50  ;;  %v390_v54 = vadd.f32 %v388_v52, %v382_v51 }
 0x2d2   :  { %478 = vpow2.f32 %v436_v53 }
 0x2d3   :  { %v396_v55 = vpop.permute.xlu1 %395 }
 0x2d4   :  { %v398_v56 = vadd.f32 %v396_v55, %v390_v54 }
 0x2d6   :  { %v445_v57 = vmul.f32 -1.442695, %v398_v56 }
 0x2d8   :  { %480 = vpow2.f32 %v445_v57 }
 0x2df   :  { %v479_v58 = vpop.eup %478 }
 0x2e0   :  { %v232_v59 = vadd.f32 1.0, %v479_v58 }
 0x2e2   :  { %482 = vrcp.f32 %v232_v59 }
 0x2e5   :  { %v481_v61 = vpop.eup %480 }
 0x2e6   :  { %v402_v62 = vadd.f32 1.0, %v481_v61 }
 0x2e8   :  { %484 = vrcp.f32 %v402_v62 }
 0x2ef   :  { %v483_v1 = vpop.eup %482 }
 0x2f0   :  { %v238_v2 = vrot.slane %v483_v1, %v237_v0 }
 0x2f2   :  { %v239_v3 = vmul.f32 %v238_v2, %v603_v31 }
 0x2f4   :  { %240 = vst.msk [vmem:[#allocation6] sm:$0xff] %vm158_vm5, %v239_v3 }
 0x2f5   :  { %v485_v4 = vpop.eup %484 }
 0x2f6   :  { %v408_v5 = vrot.slane %v485_v4, %v237_v0 }
 0x2f8   :  { %v409_v6 = vmul.f32 %v408_v5, %v609_v42 }
 0x2fa   :  { %411 = vst.msk [vmem:[#allocation6 + $0x8] sm:$0xff] %vm158_vm5, %v409_v6 }
 0x2fb   :  { %509 = shalt.err (!%p506_p9)
}
 0x2fc   :  { %s530_s25 = smov 128   ;;  %s531_s26 = smov 8  }
 0x2fd   :  { %423 = dma.vmem_to_hbm [thread:$0]  %s418_s23, 256, %s664_s7, [#allocation4], %s530_s25, %s530_s25, %s531_s26  }
 0x2fe   :  { %520 = dma.done.wait [#allocation4], 256  }
 0x2ff   :  { %521 = vsyncadd [#allocation4], 4294967040 }
 0x300   :  { %427 = vsyncpa [#allocation4], 1 }
 0x301   :  { %428 = vsyncpa [#allocation5], 1 }

</bundles_post_ra>
